<compile_context>
chip_gen: v6e
topology: v6e:2x2x1
jax: 0.10.0
libtpu: 0.0.40
codegen_flags: <defaults>
</compile_context>

<pallas_src>
import functools

import jax
import jax.numpy as jnp
from jax.experimental import pallas as pl
from jax.experimental.pallas import tpu as pltpu

EPS = 1e-5
LANES = 128


def _round_up(x, m):
    return ((x + m - 1) // m) * m


def _pick_tile_m(m_rows, k, cp, vmem_budget_bytes=8 * 1024 * 1024):
    # Dominant per-row VMEM cost in pass 1: double-buffered bf16 patches in
    # + double-buffered f32 staged-y out.  Budget kept conservative for v7x.
    per_row = 2 * (k * 2) + 2 * (cp * 4)
    tm = vmem_budget_bytes // max(per_row, 1)
    tm = int(min(tm, 2048, _round_up(m_rows, 8)))
    return max(8, (tm // 8) * 8)


def _pass1_kernel(m_valid, tile_m,
                  patches_ref, wx_ref, wg_ref, bx_ref, bg_ref,
                  y_ref, stats_ref):
    """Conv-as-matmul + GeGLU gating; stage y and accumulate sum/sumsq."""
    i = pl.program_id(0)

    @pl.when(i == 0)
    def _():
        stats_ref[...] = jnp.zeros_like(stats_ref)

    p = patches_ref[...]                                                  # [TM, K] bf16
    x_half = jnp.dot(p, wx_ref[...], preferred_element_type=jnp.float32) + bx_ref[...]
    gate = jnp.dot(p, wg_ref[...], preferred_element_type=jnp.float32) + bg_ref[...]
    y = x_half * jax.nn.sigmoid(gate)                                     # f32 elementwise (v5e-safe)

    # Mask rows past the true M so padding does not pollute the BN statistics.
    row = i * tile_m + jax.lax.broadcasted_iota(jnp.int32, (tile_m, 1), 0)
    y = jnp.where(row < m_valid, y, 0.0)

    y_ref[...] = y

    # Per-channel sum / sum-of-squares on the MXU (keeps VPU/XLU slots free).
    ones = jnp.ones((1, tile_m), jnp.float32)
    s = jnp.dot(ones, y, preferred_element_type=jnp.float32)              # [1, Cp]
    ss = jnp.dot(ones, y * y, preferred_element_type=jnp.float32)         # [1, Cp]
    stats_ref[...] = stats_ref[...] + jnp.concatenate([s, ss], axis=0)    # [2, Cp]


def _pass2_kernel(y_ref, scale_ref, shift_ref, out_ref):
    """Apply the per-channel affine normalization: y*scale + shift."""
    out_ref[...] = y_ref[...] * scale_ref[...] + shift_ref[...]


def geglu_forward(x_nchw, weight, bias, gamma, beta, *, tile_m=None):
    """x_nchw: [N, Cin, H, W]; weight: [2*Cout, Cin, 3, 3] (PyTorch OIHW)."""
    N, Cin, H, W = x_nchw.shape
    Cout2 = weight.shape[0]
    Cout = Cout2 // 2
    K = 9 * Cin
    M = N * H * W
    Cp = _round_up(Cout, LANES)

    if tile_m is None:
        tile_m = _pick_tile_m(M, K, Cp)
    tile_m = max(8, (tile_m // 8) * 8)
    M_pad = _round_up(M, tile_m)
    grid_m = M_pad // tile_m

    # ---- glue: NCHW -> NHWC, im2col (3x3, padding=1), bf16 for the MXU operand ----
    # TODO(synk): option (b) of the review (in-kernel patch construction via 9
    # shifted dot-accumulates over halo-tiled NHWC input) would cut the 9x
    # im2col HBM traffic further; here we take option (a): bf16 patches.
    x_nhwc = jnp.transpose(x_nchw, (0, 2, 3, 1))
    x_pad = jnp.pad(x_nhwc, ((0, 0), (1, 1), (1, 1), (0, 0)))
    cols = []
    for kh in range(3):
        for kw in range(3):
            cols.append(x_pad[:, kh:kh + H, kw:kw + W, :])
    patches = jnp.stack(cols, axis=3).reshape(M, K)
    patches = jnp.pad(patches, ((0, M_pad - M), (0, 0))).astype(jnp.bfloat16)

    # weight OIHW -> [kh, kw, cin, out] -> [K, 2*Cout]; split + pad to lane-dense Cp.
    w_mat = jnp.transpose(weight, (2, 3, 1, 0)).reshape(K, Cout2)
    w_x = jnp.pad(w_mat[:, :Cout], ((0, 0), (0, Cp - Cout))).astype(jnp.bfloat16)
    w_g = jnp.pad(w_mat[:, Cout:], ((0, 0), (0, Cp - Cout))).astype(jnp.bfloat16)
    b_x = jnp.pad(bias[:Cout], (0, Cp - Cout)).reshape(1, Cp).astype(jnp.float32)
    b_g = jnp.pad(bias[Cout:], (0, Cp - Cout)).reshape(1, Cp).astype(jnp.float32)
    g_row = jnp.pad(gamma, (0, Cp - Cout)).reshape(1, Cp).astype(jnp.float32)
    be_row = jnp.pad(beta, (0, Cp - Cout)).reshape(1, Cp).astype(jnp.float32)

    kernel1 = functools.partial(_pass1_kernel, M, tile_m)

    # ---- pass 1: gridded conv + GeGLU, stage y, accumulate per-channel stats ----
    y_staged, stats = pl.pallas_call(
        kernel1,
        out_shape=(jax.ShapeDtypeStruct((M_pad, Cp), jnp.float32),
                   jax.ShapeDtypeStruct((2, Cp), jnp.float32)),
        grid_spec=pltpu.PrefetchScalarGridSpec(
            num_scalar_prefetch=0,
            grid=(grid_m,),
            in_specs=[
                pl.BlockSpec((tile_m, K), lambda i: (i, 0)),   # patches (streamed)
                pl.BlockSpec((K, Cp), lambda i: (0, 0)),       # w_x (resident)
                pl.BlockSpec((K, Cp), lambda i: (0, 0)),       # w_gate (resident)
                pl.BlockSpec((1, Cp), lambda i: (0, 0)),       # bias_x
                pl.BlockSpec((1, Cp), lambda i: (0, 0)),       # bias_gate
            ],
            out_specs=[
                pl.BlockSpec((tile_m, Cp), lambda i: (i, 0)),  # staged y
                pl.BlockSpec((2, Cp), lambda i: (0, 0)),       # [sum; sumsq] accumulator
            ],
        ),
        compiler_params=pltpu.CompilerParams(
            dimension_semantics=("arbitrary",)),
    )(patches, w_x, w_g, b_x, b_g)

    # ---- tiny per-channel finalize (outside the hot loop): scale/shift ----
    mean = stats[0:1, :] / M
    var = jnp.maximum(stats[1:2, :] / M - mean * mean, 0.0)   # biased variance
    inv_std = jax.lax.rsqrt(var + EPS)
    scale = g_row * inv_std
    shift = be_row - mean * scale

    # ---- pass 2: gridded, parallel normalization ----
    out_pad = pl.pallas_call(
        _pass2_kernel,
        out_shape=jax.ShapeDtypeStruct((M_pad, Cp), jnp.float32),
        grid_spec=pltpu.PrefetchScalarGridSpec(
            num_scalar_prefetch=0,
            grid=(grid_m,),
            in_specs=[
                pl.BlockSpec((tile_m, Cp), lambda i: (i, 0)),
                pl.BlockSpec((1, Cp), lambda i: (0, 0)),
                pl.BlockSpec((1, Cp), lambda i: (0, 0)),
            ],
            out_specs=pl.BlockSpec((tile_m, Cp), lambda i: (i, 0)),
        ),
        compiler_params=pltpu.CompilerParams(
            dimension_semantics=("parallel",)),
    )(y_staged, scale, shift)

    out = out_pad[:M, :Cout].reshape(N, H, W, Cout)
    return jnp.transpose(out, (0, 3, 1, 2))


def geglu_reference(x, weight, bias, gamma, beta):
    """Pure-JAX reference mirroring the PyTorch forward (training-mode BN)."""
    y = jax.lax.conv_general_dilated(
        x, weight, window_strides=(1, 1), padding=((1, 1), (1, 1)),
        dimension_numbers=("NCHW", "OIHW", "NCHW"))
    y = y + bias.reshape(1, -1, 1, 1)
    c = y.shape[1] // 2
    h, g = y[:, :c], y[:, c:]
    z = h * jax.nn.sigmoid(g)
    mean = jnp.mean(z, axis=(0, 2, 3), keepdims=True)
    var = jnp.mean(jnp.square(z - mean), axis=(0, 2, 3), keepdims=True)
    z_norm = (z - mean) * jax.lax.rsqrt(var + EPS)
    return z_norm * gamma.reshape(1, -1, 1, 1) + beta.reshape(1, -1, 1, 1)


if __name__ == "__main__":
    key = jax.random.PRNGKey(0)

    def run_case(case_key, N, Cin, Cout, H, W, tile_m):
        k_x, k_w, k_b, k_g, k_be = jax.random.split(case_key, 5)
        x = jax.random.normal(k_x, (N, Cin, H, W), dtype=jnp.float32)
        weight = 0.1 * jax.random.normal(k_w, (2 * Cout, Cin, 3, 3), dtype=jnp.float32)
        bias = 0.1 * jax.random.normal(k_b, (2 * Cout,), dtype=jnp.float32)
        gamma = 1.0 + 0.1 * jax.random.normal(k_g, (Cout,), dtype=jnp.float32)
        beta = 0.1 * jax.random.normal(k_be, (Cout,), dtype=jnp.float32)

        out = jax.block_until_ready(
            geglu_forward(x, weight, bias, gamma, beta, tile_m=tile_m))
        assert out.shape == (N, Cout, H, W), out.shape

        # Tight structural check: reference evaluated on bf16-rounded MXU operands.
        x_bf = x.astype(jnp.bfloat16).astype(jnp.float32)
        w_bf = weight.astype(jnp.bfloat16).astype(jnp.float32)
        ref_bf = jax.block_until_ready(geglu_reference(x_bf, w_bf, bias, gamma, beta))
        assert jnp.allclose(out, ref_bf, atol=1e-3, rtol=1e-3), float(
            jnp.max(jnp.abs(out - ref_bf)))

        # Sanity check vs full-f32 module semantics (tolerance for bf16 MXU inputs).
        ref = jax.block_until_ready(geglu_reference(x, weight, bias, gamma, beta))
        assert jnp.allclose(out, ref, atol=5e-2, rtol=5e-2), float(
            jnp.max(jnp.abs(out - ref)))

    k1, k2 = jax.random.split(key)
    # Multi-tile grid: M = 2*16*16 = 512, tile_m = 128 -> 4 accumulation steps.
    run_case(k1, N=2, Cin=4, Cout=8, H=16, W=16, tile_m=128)
    # Ragged M (= 120) with tile_m = 64 exercises the padded-row masking path.
    run_case(k2, N=1, Cin=4, Cout=8, H=10, W=12, tile_m=64)

    print("KERNEL_OK")
</pallas_src>

<mosaic_0001>
module attributes {stable_mosaic.version = 11 : i64} {
  func.func @_pass1_kernel(%arg0: i32, %arg1: memref<128x36xbf16, #tpu.memory_space<vmem>>, %arg2: memref<36x128xbf16, #tpu.memory_space<vmem>>, %arg3: memref<36x128xbf16, #tpu.memory_space<vmem>>, %arg4: memref<1x128xf32, #tpu.memory_space<vmem>>, %arg5: memref<1x128xf32, #tpu.memory_space<vmem>>, %arg6: memref<128x128xf32, #tpu.memory_space<vmem>>, %arg7: memref<2x128xf32, #tpu.memory_space<vmem>>) attributes {dimension_semantics = [#tpu.dimension_semantics<arbitrary>], iteration_bounds = array<i64: 4>, scalar_prefetch = 0 : i64, scratch_operands = 0 : i64, tpu.core_type = #tpu.core_type<tc>, window_params = [{transform_indices = @transform_0, window_bounds = array<i64: 128, 36>}, {pipeline_mode = #tpu.pipeline_mode<synchronous>, transform_indices = @transform_1, window_bounds = array<i64: 36, 128>}, {pipeline_mode = #tpu.pipeline_mode<synchronous>, transform_indices = @transform_2, window_bounds = array<i64: 36, 128>}, {pipeline_mode = #tpu.pipeline_mode<synchronous>, transform_indices = @transform_3, window_bounds = array<i64: 1, 128>}, {pipeline_mode = #tpu.pipeline_mode<synchronous>, transform_indices = @transform_4, window_bounds = array<i64: 1, 128>}, {transform_indices = @transform_5, window_bounds = array<i64: 128, 128>}, {pipeline_mode = #tpu.pipeline_mode<synchronous>, transform_indices = @transform_6, window_bounds = array<i64: 2, 128>}]} {
    %c0_i32 = arith.constant 0 : i32
    %0 = arith.cmpi eq, %arg0, %c0_i32 : i32
    %1 = arith.extui %0 : i1 to i32
    %c0_i32_0 = arith.constant 0 : i32
    %2 = arith.cmpi ne, %1, %c0_i32_0 : i32
    scf.if %2 {
      %cst_22 = arith.constant 0.000000e+00 : f32
      %39 = vector.broadcast %cst_22 : f32 to vector<2x128xf32>
      %c0_23 = arith.constant 0 : index
      %c0_24 = arith.constant 0 : index
      %40 = vector.load %arg7[%c0_23, %c0_24] : memref<2x128xf32, #tpu.memory_space<vmem>>, vector<2x128xf32>
      tpu.vector_store %arg7[%c0_23, %c0_24], %39 {strides = array<i32>} : memref<2x128xf32, #tpu.memory_space<vmem>>, vector<2x128xf32>,
    } else {
    }
    %c0 = arith.constant 0 : index
    %c0_1 = arith.constant 0 : index
    %3 = vector.load %arg1[%c0, %c0_1] : memref<128x36xbf16, #tpu.memory_space<vmem>>, vector<128x36xbf16>
    %c0_2 = arith.constant 0 : index
    %c0_3 = arith.constant 0 : index
    %4 = vector.load %arg2[%c0_2, %c0_3] : memref<36x128xbf16, #tpu.memory_space<vmem>>, vector<36x128xbf16>
    %cst = arith.constant dense<0.000000e+00> : vector<128x128xf32>
    %5 = tpu.matmul %3, %4, %cst {dimension_numbers = #tpu.dot_dimension_numbers<[1], [0], [0], [1], [0, 0, 1, 1], [], []>} : vector<128x36xbf16>, vector<36x128xbf16>, vector<128x128xf32> -> vector<128x128xf32>
    %c0_4 = arith.constant 0 : index
    %c0_5 = arith.constant 0 : index
    %6 = vector.load %arg4[%c0_4, %c0_5] : memref<1x128xf32, #tpu.memory_space<vmem>>, vector<1x128xf32>
    %7 = vector.broadcast %6 : vector<1x128xf32> to vector<128x128xf32>
    %8 = arith.addf %5, %7 : vector<128x128xf32>
    %c0_6 = arith.constant 0 : index
    %c0_7 = arith.constant 0 : index
    %9 = vector.load %arg3[%c0_6, %c0_7] : memref<36x128xbf16, #tpu.memory_space<vmem>>, vector<36x128xbf16>
    %cst_8 = arith.constant dense<0.000000e+00> : vector<128x128xf32>
    %10 = tpu.matmul %3, %9, %cst_8 {dimension_numbers = #tpu.dot_dimension_numbers<[1], [0], [0], [1], [0, 0, 1, 1], [], []>} : vector<128x36xbf16>, vector<36x128xbf16>, vector<128x128xf32> -> vector<128x128xf32>
    %c0_9 = arith.constant 0 : index
    %c0_10 = arith.constant 0 : index
    %11 = vector.load %arg5[%c0_9, %c0_10] : memref<1x128xf32, #tpu.memory_space<vmem>>, vector<1x128xf32>
    %12 = vector.broadcast %11 : vector<1x128xf32> to vector<128x128xf32>
    %13 = arith.addf %10, %12 : vector<128x128xf32>
    %14 = arith.negf %13 : vector<128x128xf32>
    %15 = math.exp %14 : vector<128x128xf32>
    %cst_11 = arith.constant 1.000000e+00 : f32
    %16 = vector.broadcast %cst_11 : f32 to vector<128x128xf32>
    %17 = arith.addf %16, %15 : vector<128x128xf32>
    %18 = arith.divf %16, %17 : vector<128x128xf32>
    %19 = arith.mulf %8, %18 : vector<128x128xf32>
    %c128_i32 = arith.constant 128 : i32
    %20 = arith.muli %arg0, %c128_i32 : i32
    %21 = tpu.iota {dimensions = array<i32: 0>} : vector<128x1xi32>
    %22 = vector.broadcast %20 : i32 to vector<128x1xi32>
    %23 = arith.addi %22, %21 : vector<128x1xi32>
    %c512_i32 = arith.constant 512 : i32
    %24 = vector.broadcast %c512_i32 : i32 to vector<128x1xi32>
    %25 = arith.cmpi slt, %23, %24 : vector<128x1xi32>
    %cst_12 = arith.constant 0.000000e+00 : f32
    %26 = vector.shape_cast %25 : vector<128x1xi1> to vector<128x1xi1>
    %27 = vector.broadcast %26 : vector<128x1xi1> to vector<128x128xi1>
    %28 = vector.broadcast %cst_12 : f32 to vector<128x128xf32>
    %29 = arith.select %27, %19, %28 : vector<128x128xi1>, vector<128x128xf32>
    %c0_13 = arith.constant 0 : index
    %c0_14 = arith.constant 0 : index
    %30 = vector.load %arg6[%c0_13, %c0_14] : memref<128x128xf32, #tpu.memory_space<vmem>>, vector<128x128xf32>
    tpu.vector_store %arg6[%c0_13, %c0_14], %29 {strides = array<i32>} : memref<128x128xf32, #tpu.memory_space<vmem>>, vector<128x128xf32>,
    %cst_15 = arith.constant 1.000000e+00 : f32
    %31 = vector.broadcast %cst_15 : f32 to vector<1x128xf32>
    %cst_16 = arith.constant dense<0.000000e+00> : vector<1x128xf32>
    %32 = tpu.matmul %31, %29, %cst_16 {dimension_numbers = #tpu.dot_dimension_numbers<[1], [0], [0], [1], [0, 0, 1, 1], [], []>} : vector<1x128xf32>, vector<128x128xf32>, vector<1x128xf32> -> vector<1x128xf32>
    %33 = arith.mulf %29, %29 : vector<128x128xf32>
    %cst_17 = arith.constant dense<0.000000e+00> : vector<1x128xf32>
    %34 = tpu.matmul %31, %33, %cst_17 {dimension_numbers = #tpu.dot_dimension_numbers<[1], [0], [0], [1], [0, 0, 1, 1], [], []>} : vector<1x128xf32>, vector<128x128xf32>, vector<1x128xf32> -> vector<1x128xf32>
    %c0_18 = arith.constant 0 : index
    %c0_19 = arith.constant 0 : index
    %35 = vector.load %arg7[%c0_18, %c0_19] : memref<2x128xf32, #tpu.memory_space<vmem>>, vector<2x128xf32>
    %36 = tpu.concatenate %32, %34 in 0 : vector<1x128xf32>, vector<1x128xf32> -> vector<2x128xf32>
    %37 = arith.addf %35, %36 : vector<2x128xf32>
    %c0_20 = arith.constant 0 : index
    %c0_21 = arith.constant 0 : index
    %38 = vector.load %arg7[%c0_20, %c0_21] : memref<2x128xf32, #tpu.memory_space<vmem>>, vector<2x128xf32>
    tpu.vector_store %arg7[%c0_20, %c0_21], %37 {strides = array<i32>} : memref<2x128xf32, #tpu.memory_space<vmem>>, vector<2x128xf32>,
    return
  }
  func.func @transform_0(%arg0: i32) -> (i32, i32) {
    %c0_i32 = arith.constant 0 : i32
    %c0_i32_0 = arith.constant 0 : i32
    return %arg0, %c0_i32 : i32, i32
  }
  func.func @transform_1(%arg0: i32) -> (i32, i32) {
    %c0_i32 = arith.constant 0 : i32
    %c0_i32_0 = arith.constant 0 : i32
    %c0_i32_1 = arith.constant 0 : i32
    return %c0_i32, %c0_i32_0 : i32, i32
  }
  func.func @transform_2(%arg0: i32) -> (i32, i32) {
    %c0_i32 = arith.constant 0 : i32
    %c0_i32_0 = arith.constant 0 : i32
    %c0_i32_1 = arith.constant 0 : i32
    return %c0_i32, %c0_i32_0 : i32, i32
  }
  func.func @transform_3(%arg0: i32) -> (i32, i32) {
    %c0_i32 = arith.constant 0 : i32
    %c0_i32_0 = arith.constant 0 : i32
    %c0_i32_1 = arith.constant 0 : i32
    return %c0_i32, %c0_i32_0 : i32, i32
  }
  func.func @transform_4(%arg0: i32) -> (i32, i32) {
    %c0_i32 = arith.constant 0 : i32
    %c0_i32_0 = arith.constant 0 : i32
    %c0_i32_1 = arith.constant 0 : i32
    return %c0_i32, %c0_i32_0 : i32, i32
  }
  func.func @transform_5(%arg0: i32) -> (i32, i32) {
    %c0_i32 = arith.constant 0 : i32
    %c0_i32_0 = arith.constant 0 : i32
    return %arg0, %c0_i32 : i32, i32
  }
  func.func @transform_6(%arg0: i32) -> (i32, i32) {
    %c0_i32 = arith.constant 0 : i32
    %c0_i32_0 = arith.constant 0 : i32
    %c0_i32_1 = arith.constant 0 : i32
    return %c0_i32, %c0_i32_0 : i32, i32
  }
}

</mosaic_0001>

<bundles_post_ra>
// kernel: tpu_custom_call.1
= control target key start
LH: loop header
LB: loop body
LE: loop exit
PB: predicated region body
PF: predicated region fallthrough
CT: control target
= control target key end

     0   :  { %12 = vsyncpa [#allocation3], 0  ;;  %s2109_s0 = inlined_call_operand.vmem [shape: bf16[512,36], index: 0, kind: input, shape index: {}]   ;;  %s2110_s1 = inlined_call_operand.vmem [shape: bf16[36,128], index: 1, kind: input, shape index: {}]   ;;  %s2111_s2 = inlined_call_operand.vmem [shape: bf16[36,128], index: 2, kind: input, shape index: {}]   ;;  %s2112_s3 = inlined_call_operand.vmem [shape: f32[1,128], index: 3, kind: input, shape index: {}]   ;;  %s2113_s4 = inlined_call_operand.vmem [shape: f32[1,128], index: 4, kind: input, shape index: {}]   ;;  %s2114_s5 = inlined_call_operand.hbm [shape: f32[512,128], index: 5, kind: output, shape index: {0}]   ;;  %s2115_s6 = inlined_call_operand.hbm [shape: f32[2,128], index: 6, kind: output, shape index: {1}]  }
   0x1   :  { %14 = vsyncpa [#allocation3 + $0x1], 0 }
   0x2   :  { %15 = vsyncpa [#allocation5], 0  ;;  %s1599_s21 = smov 0   ;;  %s1601_s22 = smov 0  }
   0x3   :  { %s1603_s23 = smov 0   ;;  %s1605_s24 = smov 0  }
   0x4 LB: > { %s1620_s25 = sadd.s32 4294967295, %s1554_s24   ;;  %s1083_s26 = sadd.s32 4294967294, %s1554_s24   ;;  %s1554_s24 = sphi %s1605_s24, %s2121_s24   ;;  %s1550_s23 = sphi %s1603_s23, %s2120_s23   ;;  %s1546_s22 = sphi %s1601_s22, %s2119_s22   ;;  %s1542_s21 = sphi %s1599_s21, %s2118_s21  }
   0x5   : > { %s1624_s27 = sadd.s32 1, %s1554_s24   ;;  %s138_s28 = sadd.s32 1, %s1550_s23 }
   0x6   : > { %s135_s29 = ssub.s32 %s1554_s24, %s1624_s27  ;;  %p148_p0 = scmp.ne.s32.totalorder %s1550_s23, %s1546_s22 }
   0x7   : > { %p136_p1 = scmp.eq.s32.totalorder %s135_s29, 0  ;;  %p149_p2 = scmp.eq.s32.totalorder %s1620_s25, 3 }
   0x8   : > { %p154_p3 = scmp.ne.s32.totalorder %s1546_s22, %s1542_s21  ;;  %p155_p4 = scmp.eq.s32.totalorder %s1083_s26, 3 }
   0x9   : > { %s1635_s30 = scalar_select %p136_p1, %s1550_s23, %s138_s28  }
   0xa   : > { %p1639_p5 = por %p149_p2, %p148_p0  ;;  %p1643_p6 = por %p155_p4, %p154_p3 }
   0xb   : > { %p1086_p7 = scmp.ge.s32.totalorder %s1554_s24, 1  ;;  %p215_p8 = scmp.lt.s32.totalorder %s1554_s24, 5 }
   0xd   : > { %p216_p9 = pnand %p1086_p7, %p215_p8 }
   0xe   : > { %s240_s9 = sand.u32 (!%p216_p9), 1, %s1546_s22   ;;  %s1088_s10 = sshll.u32 (!%p216_p9), %s1620_s25, 4 }
   0xf   : > { %219 = sbr.rel (%p216_p9) target bundleno = 535 (0x217), region = 40  ;;  %s1087_s11 = sshll.u32 (!%p216_p9), %s240_s9, 7 }
  0x10   : > { %p246_p10 = scmp.lt.s32.totalorder (!%p216_p9), %s1088_s10, 63  ;;  %s1658_s16 = scalar_lea.vmem (!%p216_p9), [#allocation2], %s1087_s11 }
  0x11   : > { %p1090_p11 = scmp.ne.s32.totalorder (!%p216_p9), %s1620_s25, 0 }
  0x14   : > { %s2123_s10 = smov (!%p246_p10, %s1088_s10), 63  ;;  %256 = sbr.rel (%p1090_p11) target bundleno = 27 (0x1b), region = 44 }
  0x15   : > { %s1089_s12 = sshll.u32 %s2123_s10, 2 }
  0x16   : > { %s1656_s15 = scalar_lea.vmem %s2109_s0, %s1089_s12 }
  0x19   : > { %v1556_v0 = vmov 0.0  }
  0x1a   : > { %257 = vst [vmem:[#allocation4] sm:$0x3] %v1556_v0 }
  0x1b PF: > { %vm366_vm0 = vcmask 1041408   ;;  %v1388_v1 = vld [vmem:[%s2111_s2 + $0x10] ss:$0 sps:$4 sm:$0x33]   ;;  %v1389_v2 = vld [vmem:[%s2111_s2 + $0x8] sm:$0xff]   ;;  %vm341_vm1 = vcmask 293888   ;;  %v707_v47 = vlaneseq }
  0x1c   : > { %1335 = vmatprep.subr.msk.bf16.mxu1 %vm366_vm0, %v1388_v1  ;;  %v495_v3 = vsel %vm366_vm0, %v1388_v1, 0  ;;  %v1391_v4 = vld [vmem:[%s1656_s15] sm:$0xff]   ;;  %v1395_v6 = vld [vmem:[%s2110_s1 + $0x10] ss:$0 sps:$4 sm:$0x33]   ;;  %v1392_v7 = vld [vmem:[%s1656_s15 + $0x8] sm:$0xff]  }
  0x1d   : > { %1243 = vmatpush3.bf16.msra.mxu1 %v495_v3  ;;  %v1390_v5 = vld [vmem:[%s2111_s2] sm:$0xff]   ;;  %1248 = vmatprep.mubr.msk.bf16.mxu1 %vm341_vm1, %v1391_v4  ;;  %v1393_v8 = vld [vmem:[%s1656_s15 + $0x10] sm:$0xff]   ;;  %v368_v9 = vsel %vm366_vm0, %v1395_v6, 0  ;;  %v1398_v10 = vld [vmem:[%s2110_s1 + $0x8] sm:$0xff]   ;;  %v1557_v17 = vmov 0.0   ;;  %vm1558_vm2 = vmmov 0  }
  0x1e   : > { %1244 = vmatprep.subr.bf16.mxu1 %v1389_v2  ;;  %1226 = vmatprep.mubr.msk.bf16.mxu0 %vm341_vm1, %v1391_v4  ;;  %v1399_v11 = vld [vmem:[%s2110_s1] sm:$0xff]   ;;  %v1394_v12 = vld [vmem:[%s1656_s15 + $0x18] sm:$0xff]   ;;  %v1397_v14 = vld [vmem:[%s1656_s15 + $0x28] sm:$0xff]   ;;  %v1736_v58 = vshrl.u32 %v707_v47, 7  ;;  %s1139_s18 = sshll.u32 %s1620_s25, 7  ;;  %s1163_s26 = sshll.u32 %s1620_s25, 11 }
  0x1f   : > { %1334 = vmatprep.subr.msk.bf16.mxu0 %vm366_vm0, %v1395_v6  ;;  %v1396_v13 = vld [vmem:[%s1656_s15 + $0x20] sm:$0xff]   ;;  %v1400_v15 = vld [vmem:[%s1656_s15 + $0x30] sm:$0xff]   ;;  %v1401_v16 = vld [vmem:[%s1656_s15 + $0x38] sm:$0xff]   ;;  %s2051_s10 = scalar_lea.hbm %s2114_s5, %s1163_s26  ;;  %s999_s11 = sshll.u32 %s1658_s16, 4  ;;  %s2054_s11 = int_to_ptr.vmem [resolvable:$true] %s999_s11 }
  0x20   : > { %1221 = vmatpush3.bf16.msra.mxu0 %v368_v9  ;;  %v1714_v18 = vld [vmem:[%s2113_s4] ss:$0 sm:$0xff]  ;;  %v710_v6 = vadd.s32 16, %v1736_v58  ;;  %s2058_s12 = scalar_lea.sflag [#allocation3], %s240_s9  ;;  %s1466_s13 = scalar_lea.vmem %s2054_s11, 2048 }
  0x21   : > { %1245 = vmatpush3.bf16.msra.mxu1 %v1389_v2  ;;  %1222 = vmatprep.subr.bf16.mxu0 %v1398_v10  ;;  %p1467_p12 = scmp.ne.s32.totalorder %s2054_s11, %s1466_s13  ;;  %s1560_s14 = smov [#allocation2]  }
  0x22   : > { %1246 = vmatprep.subr.bf16.mxu1 %v1390_v5  ;;  %s1470_s17 = sshll.u32 %s1560_s14, 4  ;;  %s1471_s17 = int_to_ptr.vmem [resolvable:$false] %s1470_s17 }
  0x23   : > { %p1468_p13 = pnand %p1467_p12, %p1639_p5  ;;  %s1472_s15 = scalar_lea.vmem %s1471_s17, 4096 }
  0x24   : > { %1223 = vmatpush3.bf16.msra.mxu0 %v1398_v10  ;;  %p1473_p1 = scmp.lt.s32.totalorder %s2054_s11, %s1471_s17  ;;  %p1474_p3 = scmp.lt.s32.totalorder %s1472_s15, %s1466_s13 }
  0x25   : > { %1247 = vmatpush3.bf16.msra.mxu1 %v1390_v5  ;;  %1224 = vmatprep.subr.bf16.mxu0 %v1399_v11  ;;  %p1469_p0 = pneg %p1468_p13 }
  0x26   : > { %1299 = vmatprep.subr.mxu1 %v1557_v17  ;;  %p1475_p4 = por %p1474_p3, %p1473_p1 }
  0x28   : > { %1249 = vmatmul.mubr.msk.bf16.vlgmr.msra.gmra.mxu1 %vm341_vm1, %v1392_v7  ;;  %1225 = vmatpush3.bf16.msra.mxu0 %v1399_v11  ;;  %p1476_p7 = pnand %p1475_p4, %p1469_p0 }
  0x29   : > { %1252 = vmatprep.mubr.msk.bf16.mxu1 %vm341_vm1, %v1393_v8  ;;  %1264 = vmatprep.subr.mxu0 %v1557_v17 }
  0x2b   : > { %1227 = vmatmul.mubr.msk.bf16.vlgmr.msra.gmra.mxu0 %vm341_vm1, %v1392_v7  ;;  %v1744_v7 = vstv %s1139_s18 }
  0x2c   : > { %1230 = vmatprep.mubr.msk.bf16.mxu0 %vm341_vm1, %v1393_v8 }
  0x30   : > { %1253 = vmatmul.mubr.msk.bf16.gmra.mxu1 %vm341_vm1, %v1394_v12 }
  0x31   : > { %1256 = vmatprep.mubr.msk.bf16.mxu1 %vm341_vm1, %v1396_v13 }
  0x33   : > { %1231 = vmatmul.mubr.msk.bf16.gmra.mxu0 %vm341_vm1, %v1394_v12 }
  0x34   : > { %1234 = vmatprep.mubr.msk.bf16.mxu0 %vm341_vm1, %v1396_v13 }
  0x38   : > { %1257 = vmatmul.mubr.msk.bf16.gmra.mxu1 %vm341_vm1, %v1397_v14 }
  0x39   : > { %1260 = vmatprep.mubr.msk.bf16.mxu1 %vm341_vm1, %v1400_v15 }
  0x3b   : > { %1235 = vmatmul.mubr.msk.bf16.gmra.mxu0 %vm341_vm1, %v1397_v14 }
  0x3c   : > { %1238 = vmatprep.mubr.msk.bf16.mxu0 %vm341_vm1, %v1400_v15 }
  0x40   : > { %1261 = vmatmul.mubr.msk.bf16.gmra.mxu1 %vm341_vm1, %v1401_v16 }
  0x41   : > { %1331 = vmatprep.mubr.msk.f32.mxu1 %vm1558_vm2, %v1557_v17 }
  0x43   : > { %1239 = vmatmul.mubr.msk.bf16.gmra.mxu0 %vm341_vm1, %v1401_v16  ;;  %v1752_v16 = vld [vmem:[%s2112_s3] ss:$0 sm:$0xff] }
  0x44   : > { %1296 = vmatprep.mubr.msk.f32.mxu0 %vm1558_vm2, %v1557_v17 }
  0xe8   : > { %v1250_v19 = vpop.f32.mrf.mxu1 }
  0xe9   : > { %v540_v20 = vadd.f32 %v1250_v19, %v1714_v18 }
  0xea   : > { %v531_v21 = vpop.f32.mrf.mxu1 }
  0xeb   : > { %v1125_v22 = vmul.f32 -1.442695, %v540_v20  ;;  %v532_v23 = vadd.f32 %v1714_v18, %v531_v21  ;;  %v1720_v30 = vpop.f32.mrf.mxu0  ;;  %v1756_v21 = vadd.s32 %v1744_v7, %v710_v6  ;;  %v713_v6 = vadd.s32 40, %v1736_v58 }
  0xec   : > { %v1251_v24 = vpop.f32.mrf.mxu1 }
  0xed   : > { %1402 = vpow2.f32 %v1125_v22  ;;  %v1123_v25 = vmul.f32 -1.442695, %v532_v23  ;;  %v543_v26 = vadd.f32 %v1251_v24, %v1714_v18  ;;  %v1723_v34 = vpop.f32.mrf.mxu0  ;;  %v711_v23 = vadd.s32 24, %v1736_v58 }
  0xee   : > { %v534_v27 = vpop.f32.mrf.mxu1  ;;  %vm743_vm3 = vcmp.lt.s32.totalorder %v1756_v21, 512 }
  0xef   : > { %1404 = vpow2.f32 %v1123_v25  ;;  %v1126_v28 = vmul.f32 -1.442695, %v543_v26  ;;  %v535_v29 = vadd.f32 %v1714_v18, %v534_v27  ;;  %v1726_v38 = vpop.f32.mrf.mxu0 }
  0xf0   : > { %v1254_v31 = vpop.f32.mrf.mxu1 }
  0xf1   : > { %1406 = vpow2.f32 %v1126_v28  ;;  %v1124_v32 = vmul.f32 -1.442695, %v535_v29  ;;  %v556_v33 = vadd.f32 %v1254_v31, %v1714_v18  ;;  %v1729_v42 = vpop.f32.mrf.mxu0  ;;  %v413_v29 = vadd.f32 %v1720_v30, %v1752_v16 }
  0xf2   : > { %v547_v35 = vpop.f32.mrf.mxu1  ;;  %v1766_v31 = vadd.s32 %v1744_v7, %v1736_v58 }
  0xf3   : > { %1408 = vpow2.f32 %v1124_v32  ;;  %v1129_v36 = vmul.f32 -1.442695, %v556_v33  ;;  %v548_v37 = vadd.f32 %v1714_v18, %v547_v35  ;;  %v1733_v50 = vpop.f32.mrf.mxu0  ;;  %v709_v33 = vadd.s32 8, %v1736_v58 }
  0xf4   : > { %v1255_v39 = vpop.f32.mrf.mxu1  ;;  %vm741_vm4 = vcmp.lt.s32.totalorder %v1766_v31, 512 }
  0xf5   : > { %1410 = vpow2.f32 %v1129_v36  ;;  %v1127_v40 = vmul.f32 -1.442695, %v548_v37  ;;  %v559_v41 = vadd.f32 %v1255_v39, %v1714_v18  ;;  %v1740_v62 = vpop.f32.mrf.mxu0 }
  0xf6   : > { %v550_v43 = vpop.f32.mrf.mxu1 }
  0xf7   : > { %1412 = vpow2.f32 %v1127_v40  ;;  %v1130_v44 = vmul.f32 -1.442695, %v559_v41  ;;  %v551_v45 = vadd.f32 %v1714_v18, %v550_v43  ;;  %v1747_v11 = vpop.f32.mrf.mxu0  ;;  %v1771_v40 = vadd.s32 %v1744_v7, %v711_v23 }
  0xf8   : > { %v1258_v46 = vpop.f32.mrf.mxu1  ;;  %v714_v43 = vadd.s32 48, %v1736_v58 }
  0xf9   : > { %1414 = vpow2.f32 %v1130_v44  ;;  %v1128_v48 = vmul.f32 -1.442695, %v551_v45  ;;  %v572_v49 = vadd.f32 %v1258_v46, %v1714_v18  ;;  %v1760_v27 = vpop.f32.mrf.mxu0  ;;  %v1778_v46 = vadd.s32 %v1744_v7, %v709_v33 }
  0xfa   : > { %v1403_v51 = vpop.eup %1402  ;;  %v563_v52 = vpop.f32.mrf.mxu1  ;;  %vm744_vm5 = vcmp.lt.s32.totalorder %v1771_v40, 512 }
  0xfb   : > { %v644_v53 = vadd.f32 1.0, %v1403_v51  ;;  %1416 = vpow2.f32 %v1128_v48  ;;  %v1133_v54 = vmul.f32 -1.442695, %v572_v49  ;;  %v564_v55 = vadd.f32 %v1714_v18, %v563_v52  ;;  %v1774_v44 = vpop.f32.mrf.mxu0 }
  0xfc   : > { %v1405_v56 = vpop.eup %1404  ;;  %v1259_v57 = vpop.f32.mrf.mxu1  ;;  %v405_v48 = vadd.f32 %v1752_v16, %v1723_v34  ;;  %v712_v52 = vadd.s32 32, %v1736_v58  ;;  %v416_v34 = vadd.f32 %v1726_v38, %v1752_v16  ;;  %vm742_vm6 = vcmp.lt.s32.totalorder %v1778_v46, 512 }
  0xfd   : > { %1418 = vrcp.f32 %v644_v53  ;;  %v642_v59 = vadd.f32 1.0, %v1405_v56  ;;  %v1131_v60 = vmul.f32 -1.442695, %v564_v55  ;;  %v575_v61 = vadd.f32 %v1259_v57, %v1714_v18  ;;  %v1799_v57 = vpop.f32.mrf.mxu0 }
  0xfe   : > { %v1407_v63 = vpop.eup %1406  ;;  %1420 = vpow2.f32 %v1133_v54  ;;  %v566_v0 = vpop.f32.mrf.mxu1  ;;  %v1797_v56 = vadd.s32 %v1744_v7, %v714_v43  ;;  %v719_v43 = vadd.s32 88, %v1736_v58  ;;  %v1559_v46 = vmov 1.0  }
  0xff   : > { %1422 = vrcp.f32 %v642_v59  ;;  %v645_v1 = vadd.f32 1.0, %v1407_v63  ;;  %v1134_v2 = vmul.f32 -1.442695, %v575_v61  ;;  %v567_v3 = vadd.f32 %v1714_v18, %v566_v0 }
 0x100   : > { %v1409_v4 = vpop.eup %1408  ;;  %1424 = vpow2.f32 %v1131_v60  ;;  %v1262_v5 = vpop.f32.mrf.mxu1  ;;  %v715_v61 = vadd.s32 56, %v1736_v58  ;;  %vm747_vm7 = vcmp.lt.s32.totalorder %v1797_v56, 512 }
 0x101   : > { %1426 = vrcp.f32 %v645_v1  ;;  %v643_v8 = vadd.f32 1.0, %v1409_v4  ;;  %v1132_v9 = vmul.f32 -1.442695, %v567_v3  ;;  %v588_v10 = vadd.f32 %v1262_v5, %v1714_v18 }
 0x102   : > { %v1411_v12 = vpop.eup %1410  ;;  %1428 = vpow2.f32 %v1134_v2  ;;  %v579_v13 = vpop.f32.mrf.mxu1  ;;  %v408_v1 = vadd.f32 %v1752_v16, %v1729_v42  ;;  %v429_v2 = vadd.f32 %v1733_v50, %v1752_v16  ;;  %v1819_v5 = vadd.s32 %v1744_v7, %v712_v52 }
 0x103   : > { %1430 = vrcp.f32 %v643_v8  ;;  %v648_v14 = vadd.f32 1.0, %v1411_v12  ;;  %v1137_v15 = vmul.f32 -1.442695, %v588_v10  ;;  %v580_v19 = vadd.f32 %v1714_v18, %v579_v13  ;;  %v1830_v50 = vpop.f32.mrf.mxu0 }
 0x104   : > { %v1413_v20 = vpop.eup %1412  ;;  %1432 = vpow2.f32 %v1132_v9  ;;  %v1263_v22 = vpop.f32.mrf.mxu1  ;;  %v1835_v13 = vadd.s32 %v1744_v7, %v715_v61  ;;  %vm745_vm8 = vcmp.lt.s32.totalorder %v1819_v5, 512  ;;  %v1904_v61 = vadd.s32 %v1744_v7, %v719_v43 }
 0x105   : > { %1434 = vrcp.f32 %v648_v14  ;;  %v646_v24 = vadd.f32 1.0, %v1413_v20  ;;  %v1135_v25 = vmul.f32 -1.442695, %v580_v19  ;;  %v591_v26 = vadd.f32 %v1263_v22, %v1714_v18  ;;  %v439_v33 = vpop.f32.mrf.mxu0 }
 0x106   : > { %v1415_v28 = vpop.eup %1414  ;;  %1436 = vpow2.f32 %v1137_v15  ;;  %v582_v32 = vpop.f32.mrf.mxu1  ;;  %v718_v14 = vadd.s32 80, %v1736_v58  ;;  %v421_v22 = vadd.f32 %v1752_v16, %v1740_v62  ;;  %v432_v62 = vadd.f32 %v1747_v11, %v1752_v16 }
 0x107   : > { %1438 = vrcp.f32 %v646_v24  ;;  %v649_v35 = vadd.f32 1.0, %v1415_v28  ;;  %v1138_v36 = vmul.f32 -1.442695, %v591_v26  ;;  %v583_v37 = vadd.f32 %v1714_v18, %v582_v32 }
 0x108   : > { %v1417_v39 = vpop.eup %1416  ;;  %1440 = vpow2.f32 %v1135_v25  ;;  %v1851_v25 = vadd.s32 %v1744_v7, %v713_v6  ;;  %v716_v32 = vadd.s32 64, %v1736_v58  ;;  %vm748_vm9 = vcmp.lt.s32.totalorder %v1835_v13, 512 }
 0x109   : > { %1442 = vrcp.f32 %v649_v35  ;;  %v647_v41 = vadd.f32 1.0, %v1417_v39  ;;  %v1136_v30 = vmul.f32 -1.442695, %v583_v37  ;;  %v1867_v37 = vadd.s32 %v1744_v7, %v718_v14 }
 0x10a   : > { %v1419_v45 = vpop.eup %1418  ;;  %1444 = vpow2.f32 %v1138_v36  ;;  %vm746_vm10 = vcmp.lt.s32.totalorder %v1851_v25, 512  ;;  %v1892_v52 = vadd.s32 %v1744_v7, %v716_v32  ;;  %vm752_vm13 = vcmp.lt.s32.totalorder %v1904_v61, 512 }
 0x10b   : > { %v1421_v18 = vpop.eup %1420  ;;  %1446 = vrcp.f32 %v647_v41  ;;  %v1780_v47 = vmul.f32 %v1419_v45, %v413_v29  ;;  %vm751_vm11 = vcmp.lt.s32.totalorder %v1867_v37, 512 }
 0x10c   : > { %v1423_v49 = vpop.eup %1422  ;;  %v652_v51 = vadd.f32 1.0, %v1421_v18  ;;  %1448 = vpow2.f32 %v1136_v30  ;;  %v424_v30 = vadd.f32 %v1752_v16, %v1760_v27  ;;  %vm749_vm12 = vcmp.lt.s32.totalorder %v1892_v52, 512 }
 0x10d   : > { %v1425_v53 = vpop.eup %1424  ;;  %v1790_v54 = vsel %vm743_vm3, %v1780_v47, 0.0  ;;  %v1792_v55 = vmul.f32 %v1423_v49, %v405_v48  ;;  %v445_v48 = vadd.f32 %v1774_v44, %v1752_v16 }
 0x10e   : > { %v1427_v59 = vpop.eup %1426  ;;  %1450 = vrcp.f32 %v652_v51  ;;  %v650_v60 = vadd.f32 1.0, %v1425_v53  ;;  %807 = vst [vmem:[%s1658_s16 + $0x10] sm:$0xff] %v1790_v54  ;;  %v717_v53 = vadd.s32 72, %v1736_v58  ;;  %v893_v5 = vmul.f32 %v1790_v54, %v1790_v54 }
 0x10f   : > { %v1429_v63 = vpop.eup %1428  ;;  %v1808_v38 = vsel %vm741_vm4, %v1792_v55, 0.0  ;;  %v1810_v0 = vmul.f32 %v1427_v59, %v416_v34  ;;  %v1240_v34 = vpop.f32.mrf.mxu0 }
 0x110   : > { %v1431_v3 = vpop.eup %1430  ;;  %1452 = vrcp.f32 %v650_v60  ;;  %v653_v4 = vadd.f32 1.0, %v1429_v63  ;;  %805 = vst [vmem:[%s1658_s16] sm:$0xff] %v1808_v38  ;;  %v722_v63 = vadd.s32 112, %v1736_v58  ;;  %v891_v40 = vmul.f32 %v1808_v38, %v1808_v38 }
 0x111   : > { %v1433_v8 = vpop.eup %1432  ;;  %v1825_v9 = vsel %vm744_vm5, %v1810_v0, 0.0  ;;  %v1827_v42 = vmul.f32 %v1431_v3, %v408_v1  ;;  %v452_v6 = vpop.f32.mrf.mxu0 }
 0x112   : > { %v1435_v10 = vpop.eup %1434  ;;  %1454 = vrcp.f32 %v653_v4  ;;  %v651_v12 = vadd.f32 1.0, %v1433_v8  ;;  %808 = vst [vmem:[%s1658_s16 + $0x18] sm:$0xff] %v1825_v9  ;;  %v1915_v4 = vadd.s32 %v1744_v7, %v717_v53  ;;  %v720_v8 = vadd.s32 96, %v1736_v58 }
 0x113   : > { %v1437_v15 = vpop.eup %1436  ;;  %v1841_v19 = vsel %vm742_vm6, %v1827_v42, 0.0  ;;  %v1843_v20 = vmul.f32 %v1435_v10, %v429_v2  ;;  %v437_v2 = vadd.f32 %v1752_v16, %v1799_v57  ;;  %v448_v57 = vadd.f32 %v1830_v50, %v1752_v16 }
 0x114   : > { %v1439_v23 = vpop.eup %1438  ;;  %1456 = vrcp.f32 %v651_v12  ;;  %v656_v24 = vadd.f32 1.0, %v1437_v15  ;;  %806 = vst [vmem:[%s1658_s16 + $0x8] sm:$0xff] %v1841_v19  ;;  %v739_v15 = vadd.s32 %v1744_v7, %v722_v63  ;;  %v461_v50 = vadd.f32 %v1240_v34, %v1752_v16 }
 0x115   : > { %v1441_v26 = vpop.eup %1440  ;;  %v1856_v28 = vsel %vm747_vm7, %v1843_v20, 0.0  ;;  %v1858_v29 = vmul.f32 %v1439_v23, %v421_v22  ;;  %v723_v22 = vadd.s32 120, %v1736_v58  ;;  %vm750_vm14 = vcmp.lt.s32.totalorder %v1915_v4, 512 }
 0x116   : > { %v1443_v35 = vpop.eup %1442  ;;  %1458 = vrcp.f32 %v656_v24  ;;  %v654_v36 = vadd.f32 1.0, %v1441_v26  ;;  %811 = vst [vmem:[%s1658_s16 + $0x30] sm:$0xff] %v1856_v28  ;;  %v440_v26 = vadd.f32 %v1752_v16, %v439_v33  ;;  %v737_v32 = vadd.s32 %v1744_v7, %v720_v8 }
 0x117   : > { %v1445_v39 = vpop.eup %1444  ;;  %v1872_v41 = vsel %vm745_vm8, %v1858_v29, 0.0  ;;  %v1874_v11 = vmul.f32 %v1443_v35, %v432_v62  ;;  %v1241_v35 = vpop.f32.mrf.mxu0  ;;  %vm755_vm15 = vcmp.lt.s32.totalorder %v739_v15, 512  ;;  %v740_v33 = vadd.s32 %v1744_v7, %v723_v22 }
 0x118   : > { %v1447_v45 = vpop.eup %1446  ;;  %1460 = vrcp.f32 %v654_v36  ;;  %v657_v18 = vadd.f32 1.0, %v1445_v39  ;;  %809 = vst [vmem:[%s1658_s16 + $0x20] sm:$0xff] %v1872_v41  ;;  %v721_v36 = vadd.s32 104, %v1736_v58  ;;  %vm753_vm0 = vcmp.lt.s32.totalorder %v737_v32, 512 }
 0x119   : > { %v1449_v49 = vpop.eup %1448  ;;  %v1887_v51 = vsel %vm748_vm9, %v1874_v11, 0.0  ;;  %v1889_v27 = vmul.f32 %v1447_v45, %v424_v30  ;;  %v455_v58 = vpop.f32.mrf.mxu0  ;;  %vm756_vm1 = vcmp.lt.s32.totalorder %v740_v33, 512  ;;  %v897_v52 = vmul.f32 %v1856_v28, %v1856_v28 }
 0x11a   : > { %1462 = vrcp.f32 %v657_v18  ;;  %v655_v59 = vadd.f32 1.0, %v1449_v49  ;;  %812 = vst [vmem:[%s1658_s16 + $0x38] sm:$0xff] %v1887_v51  ;;  %v738_v53 = vadd.s32 %v1744_v7, %v721_v36  ;;  %v895_v56 = vmul.f32 %v1872_v41, %v1872_v41 }
 0x11b   : > { %v1451_v44 = vpop.eup %1450  ;;  %v1900_v60 = vsel %vm746_vm10, %v1889_v27, 0.0  ;;  %v892_v21 = vmul.f32 %v1841_v19, %v1841_v19 }
 0x11c   : > { %1464 = vrcp.f32 %v655_v59  ;;  %810 = vst [vmem:[%s1658_s16 + $0x28] sm:$0xff] %v1900_v60  ;;  %v1909_v1 = vmul.f32 %v1451_v44, %v445_v48  ;;  %v453_v48 = vadd.f32 %v1752_v16, %v452_v6  ;;  %v464_v44 = vadd.f32 %v1241_v35, %v1752_v16 }
 0x11d   : > { %v1453_v3 = vpop.eup %1452  ;;  %v456_v6 = vadd.f32 %v1752_v16, %v455_v58  ;;  %vm754_vm2 = vcmp.lt.s32.totalorder %v738_v53, 512  ;;  %v896_v13 = vmul.f32 %v1900_v60, %v1900_v60 }
 0x11e   : > { %v1921_v10 = vsel %vm751_vm11, %v1909_v1, 0.0  ;;  %v1923_v12 = vmul.f32 %v1453_v3, %v437_v2 }
 0x11f   : > { %v1455_v14 = vpop.eup %1454  ;;  %815 = vst [vmem:[%s1658_s16 + $0x50] sm:$0xff] %v1921_v10 }
 0x120   : > { %v1935_v23 = vsel %vm749_vm12, %v1923_v12, 0.0  ;;  %v701_v24 = vmul.f32 %v1455_v14, %v448_v57 }
 0x121   : > { %v1457_v62 = vpop.eup %1456  ;;  %813 = vst [vmem:[%s1658_s16 + $0x40] sm:$0xff] %v1935_v23  ;;  %v899_v37 = vmul.f32 %v1935_v23, %v1935_v23 }
 0x122   : > { %v800_v39 = vsel %vm752_vm13, %v701_v24, 0.0  ;;  %v699_v30 = vmul.f32 %v1457_v62, %v440_v26  ;;  %v901_v62 = vmul.f32 %v1921_v10, %v1921_v10 }
 0x123   : > { %v1459_v43 = vpop.eup %1458  ;;  %816 = vst [vmem:[%s1658_s16 + $0x58] sm:$0xff] %v800_v39  ;;  %v902_v15 = vmul.f32 %v800_v39, %v800_v39 }
 0x124   : > { %v798_v45 = vsel %vm750_vm14, %v699_v30, 0.0  ;;  %v704_v18 = vmul.f32 %v1459_v43, %v461_v50 }
 0x125   : > { %v1461_v49 = vpop.eup %1460  ;;  %814 = vst [vmem:[%s1658_s16 + $0x48] sm:$0xff] %v798_v45  ;;  %v900_v61 = vmul.f32 %v798_v45, %v798_v45 }
 0x126   : > { %v803_v34 = vsel %vm755_vm15, %v704_v18, 0.0  ;;  %v702_v59 = vmul.f32 %v1461_v49, %v453_v48 }
 0x127   : > { %v1463_v63 = vpop.eup %1462  ;;  %819 = vst [vmem:[%s1658_s16 + $0x70] sm:$0xff] %v803_v34  ;;  %v905_v26 = vmul.f32 %v803_v34, %v803_v34 }
 0x128   : > { %v801_v2 = vsel %vm753_vm0, %v702_v59, 0.0  ;;  %v705_v3 = vmul.f32 %v1463_v63, %v464_v44 }
 0x129   : > { %v1465_v8 = vpop.eup %1464  ;;  %817 = vst [vmem:[%s1658_s16 + $0x60] sm:$0xff] %v801_v2  ;;  %v903_v50 = vmul.f32 %v801_v2, %v801_v2 }
 0x12a   : > { %v804_v57 = vsel %vm756_vm1, %v705_v3, 0.0  ;;  %v703_v7 = vmul.f32 %v1465_v8, %v456_v6  ;;  %1265 = vmatpush3.msk.msra.mxu0 %vm756_vm1, %v705_v3 }
 0x12b   : > { %820 = vst [vmem:[%s1658_s16 + $0x78] sm:$0xff] %v804_v57  ;;  %v906_v14 = vmul.f32 %v804_v57, %v804_v57  ;;  %1266 = vmatprep.subr.mxu0 %v1557_v17 }
 0x12c   : > { %v802_v22 = vsel %vm754_vm2, %v703_v7, 0.0  ;;  %1267 = vmatpush3.msk.msra.mxu0 %vm755_vm15, %v704_v18 }
 0x12d   : > { %818 = vst [vmem:[%s1658_s16 + $0x68] sm:$0xff] %v802_v22  ;;  %1268 = vmatprep.subr.mxu0 %v1557_v17  ;;  %1300 = vmatpush3.msra.mxu1 %v906_v14  ;;  %v904_v16 = vmul.f32 %v802_v22, %v802_v22 }
 0x12e   : > { %1269 = vmatpush3.msk.msra.mxu0 %vm754_vm2, %v703_v7  ;;  %1301 = vmatprep.subr.mxu1 %v1557_v17 }
 0x12f   : > { %1270 = vmatprep.subr.mxu0 %v1557_v17  ;;  %1302 = vmatpush3.msra.mxu1 %v905_v26 }
 0x130   : > { %1271 = vmatpush3.msk.msra.mxu0 %vm753_vm0, %v702_v59  ;;  %1303 = vmatprep.subr.mxu1 %v1557_v17 }
 0x131   : > { %1272 = vmatprep.subr.mxu0 %v1557_v17  ;;  %1304 = vmatpush3.msra.mxu1 %v904_v16 }
 0x132   : > { %1273 = vmatpush3.msk.msra.mxu0 %vm752_vm13, %v701_v24  ;;  %1305 = vmatprep.subr.mxu1 %v1557_v17 }
 0x133   : > { %1274 = vmatprep.subr.mxu0 %v1557_v17  ;;  %1306 = vmatpush3.msra.mxu1 %v903_v50 }
 0x134   : > { %1275 = vmatpush3.msk.msra.mxu0 %vm751_vm11, %v1909_v1  ;;  %1307 = vmatprep.subr.mxu1 %v1557_v17  ;;  %v898_v1 = vmul.f32 %v1887_v51, %v1887_v51 }
 0x135   : > { %1276 = vmatprep.subr.mxu0 %v1557_v17  ;;  %1308 = vmatpush3.msra.mxu1 %v902_v15 }
 0x136   : > { %1277 = vmatpush3.msk.msra.mxu0 %vm750_vm14, %v699_v30  ;;  %1309 = vmatprep.subr.mxu1 %v1557_v17 }
 0x137   : > { %1278 = vmatprep.subr.mxu0 %v1557_v17  ;;  %1310 = vmatpush3.msra.mxu1 %v901_v62 }
 0x138   : > { %1279 = vmatpush3.msk.msra.mxu0 %vm749_vm12, %v1923_v12  ;;  %1311 = vmatprep.subr.mxu1 %v1557_v17 }
 0x139   : > { %1280 = vmatprep.subr.mxu0 %v1557_v17  ;;  %1312 = vmatpush3.msra.mxu1 %v900_v61 }
 0x13a   : > { %1281 = vmatpush3.msk.msra.mxu0 %vm748_vm9, %v1874_v11  ;;  %1313 = vmatprep.subr.mxu1 %v1557_v17 }
 0x13b   : > { %1282 = vmatprep.subr.mxu0 %v1557_v17  ;;  %1314 = vmatpush3.msra.mxu1 %v899_v37 }
 0x13c   : > { %1283 = vmatpush3.msk.msra.mxu0 %vm747_vm7, %v1843_v20  ;;  %1315 = vmatprep.subr.mxu1 %v1557_v17  ;;  %v894_v20 = vmul.f32 %v1825_v9, %v1825_v9 }
 0x13d   : > { %1284 = vmatprep.subr.mxu0 %v1557_v17  ;;  %1316 = vmatpush3.msra.mxu1 %v898_v1 }
 0x13e   : > { %1285 = vmatpush3.msk.msra.mxu0 %vm746_vm10, %v1889_v27  ;;  %1317 = vmatprep.subr.mxu1 %v1557_v17 }
 0x13f   : > { %1286 = vmatprep.subr.mxu0 %v1557_v17  ;;  %1318 = vmatpush3.msra.mxu1 %v897_v52 }
 0x140   : > { %1287 = vmatpush3.msk.msra.mxu0 %vm745_vm8, %v1858_v29  ;;  %1319 = vmatprep.subr.mxu1 %v1557_v17 }
 0x141   : > { %1288 = vmatprep.subr.mxu0 %v1557_v17  ;;  %1320 = vmatpush3.msra.mxu1 %v896_v13 }
 0x142   : > { %1289 = vmatpush3.msk.msra.mxu0 %vm744_vm5, %v1810_v0  ;;  %1321 = vmatprep.subr.mxu1 %v1557_v17 }
 0x143   : > { %1290 = vmatprep.subr.mxu0 %v1557_v17  ;;  %1322 = vmatpush3.msra.mxu1 %v895_v56 }
 0x144   : > { %1291 = vmatpush3.msk.msra.mxu0 %vm743_vm3, %v1780_v47  ;;  %1323 = vmatprep.subr.mxu1 %v1557_v17 }
 0x145   : > { %1292 = vmatprep.subr.mxu0 %v1557_v17  ;;  %1324 = vmatpush3.msra.mxu1 %v894_v20 }
 0x146   : > { %1293 = vmatpush3.msk.msra.mxu0 %vm742_vm6, %v1827_v42  ;;  %1325 = vmatprep.subr.mxu1 %v1557_v17 }
 0x147   : > { %1294 = vmatprep.subr.mxu0 %v1557_v17  ;;  %1326 = vmatpush3.msra.mxu1 %v893_v5 }
 0x148   : > { %1295 = vmatpush3.msk.msra.mxu0 %vm741_vm4, %v1792_v55  ;;  %1327 = vmatprep.subr.mxu1 %v1557_v17 }
 0x149   : > { %1328 = vmatpush3.msra.mxu1 %v892_v21  ;;  %1297 = vmatmul.mubr.f32.vlgmr.msra.gmra.mxu0 %v1559_v46 }
 0x14a   : > { %1329 = vmatprep.subr.mxu1 %v1557_v17 }
 0x14b   : > { %1330 = vmatpush3.msra.mxu1 %v891_v40 }
 0x14c   : > { %1332 = vmatmul.mubr.f32.vlgmr.msra.gmra.mxu1 %v1559_v46 }
 0x14d   : > { %1479 = shalt.err (!%p1476_p7)
}
 0x14e   : > { %s1480_s9 = scalar_lea.hbm %s2051_s10, 2048  ;;  %s1484_s19 = scalar_lea.hbm %s2114_s5, 8192 }
 0x14f   : > { %p1481_p8 = scmp.ne.s32.totalorder %s2051_s10, %s1480_s9  ;;  %p1485_p11 = scmp.lt.s32.totalorder %s2051_s10, %s2114_s5 }
 0x150   : > { %p1486_p12 = scmp.lt.s32.totalorder %s1484_s19, %s1480_s9 }
 0x151   : > { %p1482_p9 = pnand %p1481_p8, %p1639_p5 }
 0x152   : > { %p1487_p13 = por %p1486_p12, %p1485_p11 }
 0x153   : > { %p1483_p10 = pneg %p1482_p9 }
 0x155   : > { %p1488_p0 = pnand %p1487_p13, %p1483_p10 }
 0x157   : > { %1491 = shalt.err (!%p1488_p0)
}
 0x158   : > { %s1561_s28 = smov 128   ;;  %s1562_s29 = smov 8   ;;  %vm981_vm3 = vcmask 1040384   ;;  %v977_v55 = vld [vmem:[#allocation4] sm:$0x3] }
 0x159   : > { %1336 = dma.vmem_to_hbm [thread:$0]  (%p1639_p5), %s2054_s11, 2048, %s2051_s10, %s2058_s12, %s1561_s28, %s1561_s28, %s1562_s29  }
 0x15a   : > { %s1563_s13 = smov [#allocation4]  }
 0x15b   : > { %s1013_s14 = sshll.u32 %s1563_s13, 4  ;;  %s1014_s14 = int_to_ptr.vmem [resolvable:$true] %s1013_s14 }
 0x15c   : > { %s1492_s17 = scalar_lea.vmem %s1014_s14, 32  ;;  %p1499_p5 = scmp.lt.s32.totalorder %s1014_s14, %s1014_s14 }
 0x15d   : > { %p1493_p1 = scmp.ne.s32.totalorder %s1014_s14, %s1492_s17  ;;  %p1500_p7 = scmp.lt.s32.totalorder %s1492_s17, %s1492_s17 }
 0x15f   : > { %p1494_p3 = pnand %p1493_p1, %p149_p2  ;;  %p1501_p8 = por %p1500_p7, %p1499_p5 }
 0x161   : > { %p1495_p4 = pneg %p1494_p3 }
 0x163   : > { %p1502_p9 = pnand %p1501_p8, %p1495_p4 }
 0x209   : > { %v887_v17 = vpop.f32.mrf.mxu0 }
 0x20b   : > { %v1298_v31 = vpop.f32.mrf.mxu0 }
 0x20c   : > { %v973_v47 = vpop.f32.mrf.mxu1 }
 0x20d   : > { %v979_v54 = vrot.slane %v973_v47, 7 }
 0x20e   : > { %v1333_v38 = vpop.f32.mrf.mxu1 }
 0x20f   : > { %v982_v0 = vsel %vm981_vm3, %v887_v17, %v979_v54 }
 0x210   : > { %v983_v9 = vadd.f32 %v982_v0, %v977_v55 }
 0x212   : > { %984 = vst [vmem:[#allocation4] sm:$0x3] %v983_v9 }
 0x213   : > { %1505 = shalt.err (!%p1502_p9)
}
 0x214   : > { %1338 = dma.vmem_to_hbm [thread:$0]  (%p149_p2), %s1014_s14, 32, %s2115_s6, [#allocation5]  }
 0x215   : > { %1533 = dma.done.wait (%p149_p2), [#allocation5], 32  }
 0x216   : > { %1535 = vsyncadd (%p149_p2), [#allocation5], 4294967264 }
 0x217 PF: > { %p1348_p10 = scmp.ge.s32.totalorder %s1554_s24, 2  ;;  %s1029_s11 = sand.u32 1, %s1542_s21  }
 0x218   : > { %s1030_s12 = scalar_lea.sflag [#allocation3], %s1029_s11 }
 0x219   : > { %p1343_p11 = pnand %p1348_p10, %p1643_p6 }
 0x21b   : > { %p1344_p12 = pneg %p1343_p11 }
 0x21d   : > { %1537 = dma.done.wait (%p1344_p12), %s1030_s12, 2048  }
 0x21e   : > { %1539 = vsyncadd (%p1344_p12), %s1030_s12, 4294965248  ;;  %p18_p13 = scmp.ge.s32.totalorder %s1624_s27, 6   ;;  %s2118_s21 = smov %s1546_s22 }
 0x21f   : > { %s2119_s22 = smov %s1550_s23  ;;  %s2120_s23 = smov %s1635_s30 }
 0x220   : > { %s2121_s24 = smov %s1624_s27  ;;  %20 = sbr.rel (!%p18_p13) target bundleno = 4 (0x4), region = 87 }
 0x225   :  { %1035 = vsyncpa [#allocation3], 1 }
 0x226   :  { %1037 = vsyncpa [#allocation3 + $0x1], 1 }
 0x227   :  { %1038 = vsyncpa [#allocation5], 1 }

</bundles_post_ra>
